<compile_context>
chip_gen: v7x
topology: tpu7x:2x2x1
jax: 0.10.0
libtpu: 0.0.40
codegen_flags: <defaults>
</compile_context>

<pallas_src>
import functools

import jax
import jax.numpy as jnp
from jax.experimental import pallas as pl
from jax.experimental.pallas import tpu as pltpu

C_PAD = 128  # lane-dense padded class dimension


def mlp_kernel(x_ref, w1_ref, b1_ref, w2_ref, b2_ref, o_ref):
    # x:  (TB, 1536) bf16    w1: (1536, 32) bf16   b1: (1, 32) f32
    # w2: (32, 128)  f32     b2: (1, 128)  f32     o:  (TB, 128) f32
    x = x_ref[...]

    # Linear(1536, 32) -- bf16 inputs, f32 accumulation on the MXU.
    h = jnp.dot(x, w1_ref[...], preferred_element_type=jnp.float32) + b1_ref[...]
    # ReLU(inplace=True)
    h = jnp.maximum(h, 0.0)
    # Dropout(0.2): identity in eval mode.

    # Linear(32, 20) padded to 128 output lanes (pad bias = -1e30 -> prob ~ 0).
    logits = jnp.dot(h, w2_ref[...], preferred_element_type=jnp.float32) + b2_ref[...]

    # Softmax over the class axis (last axis). Padded lanes contribute exp(-huge)=0.
    m = jnp.max(logits, axis=-1, keepdims=True)
    e = jnp.exp(logits - m)
    inv = pl.reciprocal(jnp.sum(e, axis=-1, keepdims=True), approx=True)
    o_ref[...] = (e * inv).astype(o_ref.dtype)


@functools.partial(jax.jit, static_argnames=("block_b",))
def mlp_forward(x, w1, b1, w2, b2, *, block_b=1024):
    B, F = x.shape
    H = w1.shape[1]
    C = w2.shape[1]

    # Batch tile: full batch if small, else a multiple-of-8 tile capped at block_b.
    if B <= block_b:
        TB = B
    else:
        TB = max(8, (block_b // 8) * 8)
    grid = (pl.cdiv(B, TB),)

    # bf16 inputs for the bandwidth-dominant first matmul; weights of the tiny
    # second matmul stay f32. Pad classes to 128 lanes (bias pad = -1e30).
    x_bf = x.astype(jnp.bfloat16)
    w1_bf = w1.astype(jnp.bfloat16)
    b1_f = b1.astype(jnp.float32).reshape(1, H)
    w2_p = jnp.pad(w2.astype(jnp.float32), ((0, 0), (0, C_PAD - C)))
    b2_p = jnp.pad(b2.astype(jnp.float32).reshape(1, C),
                   ((0, 0), (0, C_PAD - C)), constant_values=-1e30)

    cost = pl.CostEstimate(
        flops=2 * B * F * H + 2 * B * H * C_PAD,
        transcendentals=B * C_PAD,
        bytes_accessed=B * F * 2 + F * H * 2 + (H + 1) * 4
        + H * C_PAD * 4 + C_PAD * 4 + B * C_PAD * 4,
    )

    out_padded = pl.pallas_call(
        mlp_kernel,
        out_shape=jax.ShapeDtypeStruct((B, C_PAD), jnp.float32),
        grid_spec=pltpu.PrefetchScalarGridSpec(
            num_scalar_prefetch=0,
            grid=grid,
            in_specs=[
                pl.BlockSpec((TB, F), lambda i: (i, 0)),      # x: tiled over batch
                pl.BlockSpec((F, H), lambda i: (0, 0)),       # w1: resident
                pl.BlockSpec((1, H), lambda i: (0, 0)),       # b1: resident
                pl.BlockSpec((H, C_PAD), lambda i: (0, 0)),   # w2 (padded): resident
                pl.BlockSpec((1, C_PAD), lambda i: (0, 0)),   # b2 (padded): resident
            ],
            out_specs=pl.BlockSpec((TB, C_PAD), lambda i: (i, 0)),
        ),
        compiler_params=pltpu.CompilerParams(
            dimension_semantics=("parallel",),
        ),
        cost_estimate=cost,
    )(x_bf, w1_bf, b1_f, w2_p, b2_p)

    return out_padded[:, :C]


def init_params(key, in_features=1536, hidden=32, num_classes=20):
    k1, k2, k3, k4 = jax.random.split(key, 4)
    # Kaiming-uniform-like init; weights stored as [in, out] (transpose of PyTorch).
    bound1 = 1.0 / jnp.sqrt(in_features)
    bound2 = 1.0 / jnp.sqrt(hidden)
    w1 = jax.random.uniform(k1, (in_features, hidden), jnp.float32, -bound1, bound1)
    b1 = jax.random.uniform(k2, (1, hidden), jnp.float32, -bound1, bound1)
    w2 = jax.random.uniform(k3, (hidden, num_classes), jnp.float32, -bound2, bound2)
    b2 = jax.random.uniform(k4, (1, num_classes), jnp.float32, -bound2, bound2)
    return w1, b1, w2, b2


if __name__ == "__main__":
    key = jax.random.PRNGKey(0)
    kx, kp = jax.random.split(key)

    B, F, H, C = 8, 1536, 32, 20
    x = jax.random.normal(kx, (B, F), jnp.float32)
    w1, b1, w2, b2 = init_params(kp, F, H, C)

    out = mlp_forward(x, w1, b1, w2, b2)
    out = jax.block_until_ready(out)

    # Reference in plain JAX (f32). Kernel uses bf16 inputs + approx reciprocal,
    # so tolerance is loosened accordingly.
    h_ref = jnp.maximum(x @ w1 + b1, 0.0)
    ref = jax.nn.softmax(h_ref @ w2 + b2, axis=1)

    assert out.shape == (B, C)
    assert jnp.allclose(out, ref, atol=2e-2, rtol=2e-2)
    assert jnp.allclose(jnp.sum(out, axis=1), jnp.ones((B,)), atol=1e-2)
    assert jnp.array_equal(jnp.argmax(out, axis=1), jnp.argmax(ref, axis=1))

    print("KERNEL_OK")
</pallas_src>

<mosaic_0001>
module attributes {stable_mosaic.version = 11 : i64} {
  func.func @mlp_kernel(%arg0: i32, %arg1: memref<8x1536xbf16, #tpu.memory_space<vmem>>, %arg2: memref<1536x32xbf16, #tpu.memory_space<vmem>>, %arg3: memref<1x32xf32, #tpu.memory_space<vmem>>, %arg4: memref<32x128xf32, #tpu.memory_space<vmem>>, %arg5: memref<1x128xf32, #tpu.memory_space<vmem>>, %arg6: memref<8x128xf32, #tpu.memory_space<vmem>>) attributes {dimension_semantics = [#tpu.dimension_semantics<parallel>], iteration_bounds = array<i64: 1>, scalar_prefetch = 0 : i64, scratch_operands = 0 : i64, tpu.core_type = #tpu.core_type<tc>, window_params = [{transform_indices = @transform_0, window_bounds = array<i64: 8, 1536>}, {pipeline_mode = #tpu.pipeline_mode<synchronous>, transform_indices = @transform_1, window_bounds = array<i64: 1536, 32>}, {pipeline_mode = #tpu.pipeline_mode<synchronous>, transform_indices = @transform_2, window_bounds = array<i64: 1, 32>}, {pipeline_mode = #tpu.pipeline_mode<synchronous>, transform_indices = @transform_3, window_bounds = array<i64: 32, 128>}, {pipeline_mode = #tpu.pipeline_mode<synchronous>, transform_indices = @transform_4, window_bounds = array<i64: 1, 128>}, {transform_indices = @transform_5, window_bounds = array<i64: 8, 128>}]} {
    %c0 = arith.constant 0 : index
    %c0_0 = arith.constant 0 : index
    %0 = vector.load %arg1[%c0, %c0_0] : memref<8x1536xbf16, #tpu.memory_space<vmem>>, vector<8x1536xbf16>
    %c0_1 = arith.constant 0 : index
    %c0_2 = arith.constant 0 : index
    %1 = vector.load %arg2[%c0_1, %c0_2] : memref<1536x32xbf16, #tpu.memory_space<vmem>>, vector<1536x32xbf16>
    %cst = arith.constant dense<0.000000e+00> : vector<8x32xf32>
    %2 = tpu.matmul %0, %1, %cst {dimension_numbers = #tpu.dot_dimension_numbers<[1], [0], [0], [1], [0, 0, 1, 1], [], []>} : vector<8x1536xbf16>, vector<1536x32xbf16>, vector<8x32xf32> -> vector<8x32xf32>
    %c0_3 = arith.constant 0 : index
    %c0_4 = arith.constant 0 : index
    %3 = vector.load %arg3[%c0_3, %c0_4] : memref<1x32xf32, #tpu.memory_space<vmem>>, vector<1x32xf32>
    %4 = vector.broadcast %3 : vector<1x32xf32> to vector<8x32xf32>
    %5 = arith.addf %2, %4 : vector<8x32xf32>
    %cst_5 = arith.constant 0.000000e+00 : f32
    %6 = vector.broadcast %cst_5 : f32 to vector<8x32xf32>
    %7 = arith.maximumf %5, %6 : vector<8x32xf32>
    %c0_6 = arith.constant 0 : index
    %c0_7 = arith.constant 0 : index
    %8 = vector.load %arg4[%c0_6, %c0_7] : memref<32x128xf32, #tpu.memory_space<vmem>>, vector<32x128xf32>
    %cst_8 = arith.constant dense<0.000000e+00> : vector<8x128xf32>
    %9 = tpu.matmul %7, %8, %cst_8 {dimension_numbers = #tpu.dot_dimension_numbers<[1], [0], [0], [1], [0, 0, 1, 1], [], []>} : vector<8x32xf32>, vector<32x128xf32>, vector<8x128xf32> -> vector<8x128xf32>
    %c0_9 = arith.constant 0 : index
    %c0_10 = arith.constant 0 : index
    %10 = vector.load %arg5[%c0_9, %c0_10] : memref<1x128xf32, #tpu.memory_space<vmem>>, vector<1x128xf32>
    %11 = vector.broadcast %10 : vector<1x128xf32> to vector<8x128xf32>
    %12 = arith.addf %9, %11 : vector<8x128xf32>
    %cst_11 = arith.constant dense<0xFF800000> : vector<8xf32>
    %13 = vector.multi_reduction <maximumf>, %12, %cst_11 [1] : vector<8x128xf32> to vector<8xf32>
    %14 = vector.shape_cast %13 : vector<8xf32> to vector<8x1xf32>
    %15 = vector.broadcast %14 : vector<8x1xf32> to vector<8x128xf32>
    %16 = arith.subf %12, %15 : vector<8x128xf32>
    %17 = math.exp %16 : vector<8x128xf32>
    %cst_12 = arith.constant dense<0.000000e+00> : vector<8xf32>
    %18 = vector.multi_reduction <add>, %17, %cst_12 [1] : vector<8x128xf32> to vector<8xf32>
    %19 = vector.shape_cast %18 : vector<8xf32> to vector<8x1xf32>
    %20 = tpu.reciprocal %19 {approx = true} : vector<8x1xf32> -> vector<8x1xf32>
    %21 = vector.broadcast %20 : vector<8x1xf32> to vector<8x128xf32>
    %22 = arith.mulf %17, %21 : vector<8x128xf32>
    %c0_13 = arith.constant 0 : index
    %c0_14 = arith.constant 0 : index
    %23 = vector.load %arg6[%c0_13, %c0_14] : memref<8x128xf32, #tpu.memory_space<vmem>>, vector<8x128xf32>
    tpu.vector_store %arg6[%c0_13, %c0_14], %22 {strides = array<i32>} : memref<8x128xf32, #tpu.memory_space<vmem>>, vector<8x128xf32>,
    return
  }
  func.func @transform_0(%arg0: i32) -> (i32, i32) {
    %c0_i32 = arith.constant 0 : i32
    %c0_i32_0 = arith.constant 0 : i32
    return %arg0, %c0_i32 : i32, i32
  }
  func.func @transform_1(%arg0: i32) -> (i32, i32) {
    %c0_i32 = arith.constant 0 : i32
    %c0_i32_0 = arith.constant 0 : i32
    %c0_i32_1 = arith.constant 0 : i32
    return %c0_i32, %c0_i32_0 : i32, i32
  }
  func.func @transform_2(%arg0: i32) -> (i32, i32) {
    %c0_i32 = arith.constant 0 : i32
    %c0_i32_0 = arith.constant 0 : i32
    %c0_i32_1 = arith.constant 0 : i32
    return %c0_i32, %c0_i32_0 : i32, i32
  }
  func.func @transform_3(%arg0: i32) -> (i32, i32) {
    %c0_i32 = arith.constant 0 : i32
    %c0_i32_0 = arith.constant 0 : i32
    %c0_i32_1 = arith.constant 0 : i32
    return %c0_i32, %c0_i32_0 : i32, i32
  }
  func.func @transform_4(%arg0: i32) -> (i32, i32) {
    %c0_i32 = arith.constant 0 : i32
    %c0_i32_0 = arith.constant 0 : i32
    %c0_i32_1 = arith.constant 0 : i32
    return %c0_i32, %c0_i32_0 : i32, i32
  }
  func.func @transform_5(%arg0: i32) -> (i32, i32) {
    %c0_i32 = arith.constant 0 : i32
    %c0_i32_0 = arith.constant 0 : i32
    return %arg0, %c0_i32 : i32, i32
  }
}

</mosaic_0001>

<bundles_post_ra>
// kernel: mlp_forward.1
= control target key start
LH: loop header
LB: loop body
LE: loop exit
PB: predicated region body
PF: predicated region fallthrough
CT: control target
= control target key end

     0   :  { %s1970_s0 = inlined_call_operand.vmem [shape: bf16[8,1536], index: 0, kind: input, shape index: {}]   ;;  %s1971_s1 = inlined_call_operand.vmem [shape: bf16[1536,32], index: 1, kind: input, shape index: {}]   ;;  %s1972_s2 = inlined_call_operand.vmem [shape: f32[1,32], index: 2, kind: input, shape index: {}]   ;;  %s1973_s3 = inlined_call_operand.vmem [shape: f32[32,128], index: 3, kind: input, shape index: {}]   ;;  %s1974_s4 = inlined_call_operand.vmem [shape: f32[1,128], index: 4, kind: input, shape index: {}]   ;;  %s1975_s5 = inlined_call_operand.hbm [shape: f32[8,128], index: 5, kind: output, shape index: {}]  }
   0x1   :  { %v1464_v0 = vld [vmem:[%s1971_s1 + $0x40] sm:$0xff]   ;;  %v1468_v4 = vld [vmem:[%s1971_s1 + $0x48] sm:$0xff]   ;;  %v1472_v8 = vld [vmem:[%s1971_s1 + $0x50] sm:$0xff]  }
   0x2   :  { %v1465_v1 = vld [vmem:[%s1971_s1 + $0xc0] sm:$0xff]   ;;  %1306 = vmatprep.subr.bf16.mxu0 %v1464_v0  ;;  %v1469_v5 = vld [vmem:[%s1971_s1 + $0xc8] sm:$0xff]   ;;  %v1473_v9 = vld [vmem:[%s1971_s1 + $0xd0] sm:$0xff]  }
   0x3   :  { %v1466_v2 = vld [vmem:[%s1971_s1] sm:$0xff]   ;;  %1328 = vmatprep.subr.bf16.mxu1 %v1465_v1  ;;  %v1470_v6 = vld [vmem:[%s1971_s1 + $0x8] sm:$0xff]   ;;  %v1474_v10 = vld [vmem:[%s1971_s1 + $0x10] sm:$0xff]  }
   0x4   :  { %v1467_v3 = vld [vmem:[%s1971_s1 + $0x80] sm:$0xff]   ;;  %1307 = vmatpush3.bf16.msra.mxu0 %v1466_v2  ;;  %v1471_v7 = vld [vmem:[%s1971_s1 + $0x88] sm:$0xff]   ;;  %v1475_v11 = vld [vmem:[%s1971_s1 + $0x90] sm:$0xff]  }
   0x5   :  { %1329 = vmatpush3.bf16.msra.mxu1 %v1467_v3  ;;  %1308 = vmatprep.subr.bf16.mxu0 %v1468_v4  ;;  %v1476_v12 = vld [vmem:[%s1971_s1 + $0x58] sm:$0xff]   ;;  %v1480_v16 = vld [vmem:[%s1971_s1 + $0x60] sm:$0xff]   ;;  %v1484_v20 = vld [vmem:[%s1971_s1 + $0x68] sm:$0xff]  }
   0x6   :  { %1330 = vmatprep.subr.bf16.mxu1 %v1469_v5  ;;  %v1477_v13 = vld [vmem:[%s1971_s1 + $0xd8] sm:$0xff]   ;;  %v1481_v17 = vld [vmem:[%s1971_s1 + $0xe0] sm:$0xff]   ;;  %v1485_v21 = vld [vmem:[%s1971_s1 + $0xe8] sm:$0xff]  }
   0x7   :  { %v1478_v14 = vld [vmem:[%s1971_s1 + $0x18] sm:$0xff]   ;;  %v1482_v18 = vld [vmem:[%s1971_s1 + $0x20] sm:$0xff]   ;;  %v1486_v22 = vld [vmem:[%s1971_s1 + $0x28] sm:$0xff]  }
   0x8   :  { %1309 = vmatpush3.bf16.msra.mxu0 %v1470_v6  ;;  %v1479_v15 = vld [vmem:[%s1971_s1 + $0x98] sm:$0xff]   ;;  %v1483_v19 = vld [vmem:[%s1971_s1 + $0xa0] sm:$0xff]   ;;  %v1487_v23 = vld [vmem:[%s1971_s1 + $0xa8] sm:$0xff]  }
   0x9   :  { %1331 = vmatpush3.bf16.msra.mxu1 %v1471_v7  ;;  %1310 = vmatprep.subr.bf16.mxu0 %v1472_v8  ;;  %v1488_v24 = vld [vmem:[%s1971_s1 + $0x70] sm:$0xff]   ;;  %v1492_v28 = vld [vmem:[%s1971_s1 + $0x78] sm:$0xff]   ;;  %v22_v32 = vld [vmem:[%s1970_s0] sm:$0xff] }
   0xa   :  { %1332 = vmatprep.subr.bf16.mxu1 %v1473_v9  ;;  %v1489_v25 = vld [vmem:[%s1971_s1 + $0xf0] sm:$0xff]   ;;  %v1493_v29 = vld [vmem:[%s1971_s1 + $0xf8] sm:$0xff]   ;;  %v23_v33 = vld [vmem:[%s1970_s0 + $0x8] sm:$0xff]  ;;  %v1196_v34 = vcombine.low %v22_v32, %v22_v32  ;;  %v1197_v35 = vcombine.high %v22_v32, %v22_v32 }
   0xb   :  { %v1490_v26 = vld [vmem:[%s1971_s1 + $0x30] sm:$0xff]   ;;  %v1494_v30 = vld [vmem:[%s1971_s1 + $0x38] sm:$0xff]   ;;  %v1198_v36 = vcombine.low %v23_v33, %v23_v33  ;;  %v1199_v37 = vcombine.high %v23_v33, %v23_v33  ;;  %v1500_v38 = vld [vmem:[%s1971_s1 + $0x140] sm:$0xff]  }
   0xc   :  { %1311 = vmatpush3.bf16.msra.mxu0 %v1474_v10  ;;  %v1491_v27 = vld [vmem:[%s1971_s1 + $0xb0] sm:$0xff]   ;;  %v1495_v31 = vld [vmem:[%s1971_s1 + $0xb8] sm:$0xff]   ;;  %v1501_v39 = vld [vmem:[%s1971_s1 + $0x1c0] sm:$0xff]   ;;  %877 = vmatprep.mubr.bf16.mxu0 %v1197_v35 }
   0xd   :  { %1333 = vmatpush3.bf16.msra.mxu1 %v1475_v11  ;;  %1312 = vmatprep.subr.bf16.mxu0 %v1476_v12  ;;  %v1502_v40 = vld [vmem:[%s1971_s1 + $0x100] sm:$0xff]   ;;  %v1504_v42 = vld [vmem:[%s1971_s1 + $0x148] sm:$0xff]   ;;  %v1508_v46 = vld [vmem:[%s1971_s1 + $0x150] sm:$0xff]  }
   0xe   :  { %1334 = vmatprep.subr.bf16.mxu1 %v1477_v13  ;;  %917 = vmatprep.mubr.bf16.mxu1 %v1199_v37  ;;  %v1503_v41 = vld [vmem:[%s1971_s1 + $0x180] sm:$0xff]   ;;  %v1505_v43 = vld [vmem:[%s1971_s1 + $0x1c8] sm:$0xff]   ;;  %v1509_v47 = vld [vmem:[%s1971_s1 + $0x1d0] sm:$0xff]  }
   0xf   :  { %v1506_v44 = vld [vmem:[%s1971_s1 + $0x108] sm:$0xff]   ;;  %v1510_v48 = vld [vmem:[%s1971_s1 + $0x110] sm:$0xff]   ;;  %v1512_v50 = vld [vmem:[%s1971_s1 + $0x158] sm:$0xff]  }
  0x10   :  { %1313 = vmatpush3.bf16.msra.mxu0 %v1478_v14  ;;  %v1507_v45 = vld [vmem:[%s1971_s1 + $0x188] sm:$0xff]   ;;  %v1511_v49 = vld [vmem:[%s1971_s1 + $0x190] sm:$0xff]   ;;  %v1513_v51 = vld [vmem:[%s1971_s1 + $0x1d8] sm:$0xff]  }
  0x11   :  { %1335 = vmatpush3.bf16.msra.mxu1 %v1479_v15  ;;  %1314 = vmatprep.subr.bf16.mxu0 %v1480_v16  ;;  %v1514_v52 = vld [vmem:[%s1971_s1 + $0x118] sm:$0xff]   ;;  %v1516_v54 = vld [vmem:[%s1971_s1 + $0x160] sm:$0xff]   ;;  %v1520_v58 = vld [vmem:[%s1971_s1 + $0x168] sm:$0xff]  }
  0x12   :  { %1336 = vmatprep.subr.bf16.mxu1 %v1481_v17  ;;  %v1515_v53 = vld [vmem:[%s1971_s1 + $0x198] sm:$0xff]   ;;  %v1517_v55 = vld [vmem:[%s1971_s1 + $0x1e0] sm:$0xff]   ;;  %v1521_v59 = vld [vmem:[%s1971_s1 + $0x1e8] sm:$0xff]  }
  0x13   :  { %v1518_v56 = vld [vmem:[%s1971_s1 + $0x120] sm:$0xff]   ;;  %v1522_v60 = vld [vmem:[%s1971_s1 + $0x128] sm:$0xff]   ;;  %v1524_v62 = vld [vmem:[%s1971_s1 + $0x170] sm:$0xff]  }
  0x14   :  { %1315 = vmatpush3.bf16.msra.mxu0 %v1482_v18  ;;  %v1519_v57 = vld [vmem:[%s1971_s1 + $0x1a0] sm:$0xff]   ;;  %v1523_v61 = vld [vmem:[%s1971_s1 + $0x1a8] sm:$0xff]   ;;  %v1525_v63 = vld [vmem:[%s1971_s1 + $0x1f0] sm:$0xff]  }
  0x15   :  { %1337 = vmatpush3.bf16.msra.mxu1 %v1483_v19  ;;  %1316 = vmatprep.subr.bf16.mxu0 %v1484_v20  ;;  %v1526_v0 = vld [vmem:[%s1971_s1 + $0x130] sm:$0xff]   ;;  %v1528_v2 = vld [vmem:[%s1971_s1 + $0x178] sm:$0xff]   ;;  %v1536_v12 = vld [vmem:[%s1971_s1 + $0x240] sm:$0xff]  }
  0x16   :  { %1338 = vmatprep.subr.bf16.mxu1 %v1485_v21  ;;  %v1527_v1 = vld [vmem:[%s1971_s1 + $0x1b0] sm:$0xff]   ;;  %v1529_v3 = vld [vmem:[%s1971_s1 + $0x1f8] sm:$0xff]   ;;  %v1537_v13 = vld [vmem:[%s1971_s1 + $0x2c0] sm:$0xff]  }
  0x17   :  { %v1530_v4 = vld [vmem:[%s1971_s1 + $0x138] sm:$0xff]   ;;  %v24_v6 = vld [vmem:[%s1970_s0 + $0x10] sm:$0xff]  ;;  %v1538_v14 = vld [vmem:[%s1971_s1 + $0x200] sm:$0xff]  }
  0x18   :  { %1317 = vmatpush3.bf16.msra.mxu0 %v1486_v22  ;;  %v1531_v5 = vld [vmem:[%s1971_s1 + $0x1b8] sm:$0xff]   ;;  %v1200_v7 = vcombine.low %v24_v6, %v24_v6  ;;  %v1201_v8 = vcombine.high %v24_v6, %v24_v6  ;;  %v1539_v15 = vld [vmem:[%s1971_s1 + $0x280] sm:$0xff]   ;;  %v1540_v16 = vld [vmem:[%s1971_s1 + $0x248] sm:$0xff]  }
  0x19   :  { %1339 = vmatpush3.bf16.msra.mxu1 %v1487_v23  ;;  %1318 = vmatprep.subr.bf16.mxu0 %v1488_v24  ;;  %v25_v9 = vld [vmem:[%s1970_s0 + $0x18] sm:$0xff]  ;;  %v1541_v17 = vld [vmem:[%s1971_s1 + $0x2c8] sm:$0xff]   ;;  %v1544_v20 = vld [vmem:[%s1971_s1 + $0x250] sm:$0xff]  }
  0x1a   :  { %1340 = vmatprep.subr.bf16.mxu1 %v1489_v25  ;;  %v1202_v10 = vcombine.low %v25_v9, %v25_v9  ;;  %v1203_v11 = vcombine.high %v25_v9, %v25_v9  ;;  %v1542_v18 = vld [vmem:[%s1971_s1 + $0x208] sm:$0xff]   ;;  %v1545_v21 = vld [vmem:[%s1971_s1 + $0x2d0] sm:$0xff]   ;;  %v1548_v24 = vld [vmem:[%s1971_s1 + $0x258] sm:$0xff]  }
  0x1b   :  { %v1543_v19 = vld [vmem:[%s1971_s1 + $0x288] sm:$0xff]   ;;  %v1546_v22 = vld [vmem:[%s1971_s1 + $0x210] sm:$0xff]   ;;  %v1549_v25 = vld [vmem:[%s1971_s1 + $0x2d8] sm:$0xff]  }
  0x1c   :  { %1319 = vmatpush3.bf16.msra.mxu0 %v1490_v26  ;;  %v1547_v23 = vld [vmem:[%s1971_s1 + $0x290] sm:$0xff]   ;;  %v1550_v26 = vld [vmem:[%s1971_s1 + $0x218] sm:$0xff]   ;;  %v1556_v32 = vld [vmem:[%s1971_s1 + $0x268] sm:$0xff]  }
  0x1d   :  { %1341 = vmatpush3.bf16.msra.mxu1 %v1491_v27  ;;  %1320 = vmatprep.subr.bf16.mxu0 %v1492_v28  ;;  %v1551_v27 = vld [vmem:[%s1971_s1 + $0x298] sm:$0xff]   ;;  %v1552_v28 = vld [vmem:[%s1971_s1 + $0x260] sm:$0xff]   ;;  %v1557_v33 = vld [vmem:[%s1971_s1 + $0x2e8] sm:$0xff]  }
  0x1e   :  { %1342 = vmatprep.subr.bf16.mxu1 %v1493_v29  ;;  %v1553_v29 = vld [vmem:[%s1971_s1 + $0x2e0] sm:$0xff]   ;;  %v1559_v35 = vld [vmem:[%s1971_s1 + $0x2a8] sm:$0xff]   ;;  %v1561_v37 = vld [vmem:[%s1971_s1 + $0x2f0] sm:$0xff]  }
  0x20   :  { %1321 = vmatpush3.bf16.msra.mxu0 %v1494_v30  ;;  %v1554_v30 = vld [vmem:[%s1971_s1 + $0x220] sm:$0xff]  }
  0x21   :  { %1343 = vmatpush3.bf16.msra.mxu1 %v1495_v31  ;;  %1350 = vmatprep.subr.bf16.mxu0 %v1500_v38  ;;  %v1555_v31 = vld [vmem:[%s1971_s1 + $0x2a0] sm:$0xff]   ;;  %v1562_v38 = vld [vmem:[%s1971_s1 + $0x230] sm:$0xff]  }
  0x22   :  { %1372 = vmatprep.subr.bf16.mxu1 %v1501_v39  ;;  %v1563_v39 = vld [vmem:[%s1971_s1 + $0x2b0] sm:$0xff]  }
  0x23   :  { %878 = vmatmul.mubr.bf16.vlgmr.msra.gmra.mrb[0].mxu0 %v1196_v34  ;;  %v1558_v34 = vld [vmem:[%s1971_s1 + $0x228] sm:$0xff]  }
  0x24   :  { %918 = vmatmul.mubr.bf16.vlgmr.msra.gmra.mrb[0].mxu1 %v1198_v36  ;;  %1351 = vmatpush3.bf16.msra.mxu0 %v1502_v40  ;;  %v1560_v36 = vld [vmem:[%s1971_s1 + $0x270] sm:$0xff]   ;;  %v1564_v40 = vld [vmem:[%s1971_s1 + $0x278] sm:$0xff]  }
  0x25   :  { %1373 = vmatpush3.bf16.msra.mxu1 %v1503_v41  ;;  %1352 = vmatprep.subr.bf16.mxu0 %v1504_v42  ;;  %v1565_v41 = vld [vmem:[%s1971_s1 + $0x2f8] sm:$0xff]  }
  0x26   :  { %1374 = vmatprep.subr.bf16.mxu1 %v1505_v43  ;;  %957 = vmatprep.mubr.bf16.mxu0 %v1201_v8  ;;  %v1566_v42 = vld [vmem:[%s1971_s1 + $0x238] sm:$0xff]  }
  0x27   :  { %997 = vmatprep.mubr.bf16.mxu1 %v1203_v11  ;;  %v1567_v43 = vld [vmem:[%s1971_s1 + $0x2b8] sm:$0xff]  }
  0x28   :  { %1353 = vmatpush3.bf16.msra.mxu0 %v1506_v44  ;;  %v26_v44 = vld [vmem:[%s1970_s0 + $0x20] sm:$0xff] }
  0x29   :  { %1375 = vmatpush3.bf16.msra.mxu1 %v1507_v45  ;;  %1354 = vmatprep.subr.bf16.mxu0 %v1508_v46  ;;  %v27_v45 = vld [vmem:[%s1970_s0 + $0x28] sm:$0xff]  ;;  %v1204_v46 = vcombine.low %v26_v44, %v26_v44 }
  0x2a   :  { %1376 = vmatprep.subr.bf16.mxu1 %v1509_v47  ;;  %v1205_v47 = vcombine.high %v26_v44, %v26_v44 }
  0x2c   :  { %1355 = vmatpush3.bf16.msra.mxu0 %v1510_v48  ;;  %v1206_v48 = vcombine.low %v27_v45, %v27_v45 }
  0x2d   :  { %1377 = vmatpush3.bf16.msra.mxu1 %v1511_v49  ;;  %1356 = vmatprep.subr.bf16.mxu0 %v1512_v50  ;;  %v1207_v49 = vcombine.high %v27_v45, %v27_v45 }
  0x2e   :  { %1378 = vmatprep.subr.bf16.mxu1 %v1513_v51 }
  0x30   :  { %1357 = vmatpush3.bf16.msra.mxu0 %v1514_v52 }
  0x31   :  { %1379 = vmatpush3.bf16.msra.mxu1 %v1515_v53  ;;  %1358 = vmatprep.subr.bf16.mxu0 %v1516_v54 }
  0x32   :  { %1380 = vmatprep.subr.bf16.mxu1 %v1517_v55 }
  0x34   :  { %1359 = vmatpush3.bf16.msra.mxu0 %v1518_v56 }
  0x35   :  { %1381 = vmatpush3.bf16.msra.mxu1 %v1519_v57  ;;  %1360 = vmatprep.subr.bf16.mxu0 %v1520_v58 }
  0x36   :  { %1382 = vmatprep.subr.bf16.mxu1 %v1521_v59 }
  0x38   :  { %1361 = vmatpush3.bf16.msra.mxu0 %v1522_v60 }
  0x39   :  { %1383 = vmatpush3.bf16.msra.mxu1 %v1523_v61  ;;  %1362 = vmatprep.subr.bf16.mxu0 %v1524_v62 }
  0x3a   :  { %1384 = vmatprep.subr.bf16.mxu1 %v1525_v63 }
  0x3c   :  { %1363 = vmatpush3.bf16.msra.mxu0 %v1526_v0 }
  0x3d   :  { %1385 = vmatpush3.bf16.msra.mxu1 %v1527_v1  ;;  %1364 = vmatprep.subr.bf16.mxu0 %v1528_v2 }
  0x3e   :  { %1386 = vmatprep.subr.bf16.mxu1 %v1529_v3 }
  0x40   :  { %1365 = vmatpush3.bf16.msra.mxu0 %v1530_v4 }
  0x41   :  { %1387 = vmatpush3.bf16.msra.mxu1 %v1531_v5  ;;  %1394 = vmatprep.subr.bf16.mxu0 %v1536_v12 }
  0x42   :  { %1416 = vmatprep.subr.bf16.mxu1 %v1537_v13 }
  0x43   :  { %958 = vmatmul.mubr.bf16.vlgmr.msra.gmra.mrb[4].mxu0 %v1200_v7 }
  0x44   :  { %998 = vmatmul.mubr.bf16.vlgmr.msra.gmra.mrb[4].mxu1 %v1202_v10  ;;  %1395 = vmatpush3.bf16.msra.mxu0 %v1538_v14 }
  0x45   :  { %1417 = vmatpush3.bf16.msra.mxu1 %v1539_v15  ;;  %1396 = vmatprep.subr.bf16.mxu0 %v1540_v16 }
  0x46   :  { %1418 = vmatprep.subr.bf16.mxu1 %v1541_v17 }
  0x48   :  { %1397 = vmatpush3.bf16.msra.mxu0 %v1542_v18 }
  0x49   :  { %1419 = vmatpush3.bf16.msra.mxu1 %v1543_v19  ;;  %1398 = vmatprep.subr.bf16.mxu0 %v1544_v20 }
  0x4a   :  { %1420 = vmatprep.subr.bf16.mxu1 %v1545_v21 }
  0x4c   :  { %1399 = vmatpush3.bf16.msra.mxu0 %v1546_v22 }
  0x4d   :  { %1421 = vmatpush3.bf16.msra.mxu1 %v1547_v23  ;;  %1400 = vmatprep.subr.bf16.mxu0 %v1548_v24 }
  0x4e   :  { %1422 = vmatprep.subr.bf16.mxu1 %v1549_v25 }
  0x50   :  { %1401 = vmatpush3.bf16.msra.mxu0 %v1550_v26 }
  0x51   :  { %1423 = vmatpush3.bf16.msra.mxu1 %v1551_v27  ;;  %1402 = vmatprep.subr.bf16.mxu0 %v1552_v28 }
  0x52   :  { %1424 = vmatprep.subr.bf16.mxu1 %v1553_v29 }
  0x54   :  { %1403 = vmatpush3.bf16.msra.mxu0 %v1554_v30 }
  0x55   :  { %1425 = vmatpush3.bf16.msra.mxu1 %v1555_v31  ;;  %1404 = vmatprep.subr.bf16.mxu0 %v1556_v32 }
  0x56   :  { %1426 = vmatprep.subr.bf16.mxu1 %v1557_v33 }
  0x58   :  { %1405 = vmatpush3.bf16.msra.mxu0 %v1558_v34 }
  0x59   :  { %1427 = vmatpush3.bf16.msra.mxu1 %v1559_v35  ;;  %1406 = vmatprep.subr.bf16.mxu0 %v1560_v36 }
  0x5a   :  { %1428 = vmatprep.subr.bf16.mxu1 %v1561_v37 }
  0x5c   :  { %1407 = vmatpush3.bf16.msra.mxu0 %v1562_v38 }
  0x5d   :  { %1429 = vmatpush3.bf16.msra.mxu1 %v1563_v39  ;;  %1408 = vmatprep.subr.bf16.mxu0 %v1564_v40 }
  0x5e   :  { %1430 = vmatprep.subr.bf16.mxu1 %v1565_v41 }
  0x60   :  { %1409 = vmatpush3.bf16.msra.mxu0 %v1566_v42 }
  0x61   :  { %10 = vsyncpa [#allocation3], 0  ;;  %1431 = vmatpush3.bf16.msra.mxu1 %v1567_v43  ;;  %1037 = vmatprep.mubr.bf16.mxu0 %v1205_v47  ;;  %v1086_v50 = vld [vmem:[%s1973_s3] sm:$0xff]  ;;  %v1087_v51 = vld [vmem:[%s1973_s3 + $0x8] sm:$0xff]  ;;  %v1600_v53 = vmov 0.0|0.0   ;;  %vm1601_vm0 = vmmov 0  }
  0x62   :  { %1077 = vmatprep.mubr.bf16.mxu1 %v1207_v49  ;;  %v1455_v52 = vpack.c.bf16 %v1087_v51, %v1086_v50  ;;  %1454 = vmatprep.subr.bf16.mxu0 %v1600_v53  ;;  %v1088_v54 = vld [vmem:[%s1973_s3 + $0x10] sm:$0xff]  ;;  %v1089_v55 = vld [vmem:[%s1973_s3 + $0x18] sm:$0xff]  ;;  %v1602_v57 = vmov 0.0   ;;  %v1195_v60 = vld [vmem:[%s1972_s2] ss:$0 sm:$0xff]  ;;  %vm1097_vm1 = vcmask 261120  }
  0x63   :  { %1038 = vmatmul.mubr.bf16.vlgmr.msra.gmra.mrb[8].mxu0 %v1204_v46  ;;  %v1458_v56 = vpack.c.bf16 %v1089_v55, %v1088_v54  ;;  %v1304_v32 = vld [vmem:[%s1974_s4] ss:$0 sm:$0xff]  ;;  %s1603_s30 = smov [#allocation2]  }
  0x64   :  { %1078 = vmatmul.mubr.bf16.vlgmr.msra.gmra.mrb[8].mxu1 %v1206_v48  ;;  %1456 = vmatpush3.bf16.msra.mxu0 %v1455_v52  ;;  %s1187_s6 = sshll.u32 %s1603_s30, 4  ;;  %s1188_s6 = int_to_ptr.vmem [resolvable:$true] %s1187_s6 }
  0x65   :  { %1457 = vmatprep.subr.bf16.mxu0 %v1600_v53  ;;  %1451 = vmatprep.mubr.msk.f32.mxu0 %vm1601_vm0, %v1602_v57  ;;  %s1576_s7 = scalar_lea.vmem %s1188_s6, 128  ;;  %p1581_p1 = scmp.lt.s32.totalorder %s1188_s6, %s1188_s6 }
  0x66   :  { %p1577_p0 = scmp.ne.s32.totalorder %s1188_s6, %s1576_s7  ;;  %p1582_p2 = scmp.lt.s32.totalorder %s1576_s7, %s1576_s7 }
  0x68   :  { %1459 = vmatpush3.bf16.msra.mxu0 %v1458_v56  ;;  %p1583_p3 = por %p1582_p2, %p1581_p1 }
  0x6a   :  { %p1584_p4 = pnand %p1583_p3, %p1577_p0 }
  0xf6   :  { %v1322_v58 = vpop.f32.mrb[0].mxu0 }
  0xf7   :  { %v1344_v59 = vpop.f32.mrb[0].mxu1  ;;  %v1323_v61 = vpop.f32.mrb[1].mxu0 }
  0xf8   :  { %v1345_v62 = vpop.f32.mrb[1].mxu1  ;;  %v1324_v63 = vadd.f32 %v1323_v61, %v1322_v58  ;;  %v1325_v1 = vpop.f32.mrb[2].mxu0 }
  0xf9   :  { %v1346_v0 = vadd.f32 %v1345_v62, %v1344_v59  ;;  %v1347_v2 = vpop.f32.mrb[2].mxu1  ;;  %v1326_v3 = vpop.f32.mrb[3].mxu0 }
  0xfa   :  { %v1348_v4 = vpop.f32.mrb[3].mxu1  ;;  %v880_v5 = vadd.f32 %v1324_v63, %v1195_v60 }
  0xfc   :  { %v920_v6 = vadd.f32 %v1346_v0, %v880_v5 }
 0x116   :  { %v1366_v7 = vpop.f32.mrb[4].mxu0 }
 0x117   :  { %v1388_v8 = vpop.f32.mrb[4].mxu1  ;;  %v1367_v9 = vpop.f32.mrb[5].mxu0 }
 0x118   :  { %v1389_v10 = vpop.f32.mrb[5].mxu1  ;;  %v1368_v11 = vadd.f32 %v1367_v9, %v1366_v7  ;;  %v1369_v13 = vpop.f32.mrb[6].mxu0 }
 0x119   :  { %v1390_v12 = vadd.f32 %v1389_v10, %v1388_v8  ;;  %v1391_v14 = vpop.f32.mrb[6].mxu1  ;;  %v1370_v15 = vpop.f32.mrb[7].mxu0 }
 0x11a   :  { %v1392_v16 = vpop.f32.mrb[7].mxu1  ;;  %v960_v17 = vadd.f32 %v1368_v11, %v920_v6 }
 0x11c   :  { %v1000_v18 = vadd.f32 %v1390_v12, %v960_v17 }
 0x136   :  { %v1410_v19 = vpop.f32.mrb[8].mxu0 }
 0x137   :  { %v1432_v20 = vpop.f32.mrb[8].mxu1  ;;  %v1411_v21 = vpop.f32.mrb[9].mxu0 }
 0x138   :  { %v1412_v22 = vadd.f32 %v1411_v21, %v1410_v19  ;;  %v1433_v23 = vpop.f32.mrb[9].mxu1  ;;  %v1413_v24 = vpop.f32.mrb[10].mxu0 }
 0x139   :  { %v1434_v25 = vadd.f32 %v1433_v23, %v1432_v20  ;;  %v1435_v26 = vpop.f32.mrb[10].mxu1  ;;  %v1414_v27 = vpop.f32.mrb[11].mxu0 }
 0x13a   :  { %v1040_v28 = vadd.f32 %v1412_v22, %v1000_v18  ;;  %v1436_v29 = vpop.f32.mrb[11].mxu1 }
 0x13c   :  { %v1080_v30 = vadd.f32 %v1434_v25, %v1040_v28 }
 0x13e   :  { %v1085_v31 = vmax.f32 %v1080_v30, 0.0 }
 0x140   :  { %1452 = vmatmul.mubr.msk.f32.vlgmr.msra.gmra.mrb[12].mxu0 %vm1097_vm1, %v1085_v31 }
 0x213   :  { %v1167_v33 = vpop.f32.mrb[12].mxu0 }
 0x214   :  { %v1168_v34 = vadd.f32 %v1304_v32, %v1167_v33  ;;  %v1453_v35 = vpop.f32.mrb[13].mxu0 }
 0x216   :  { %1171 = vmax.xlane.f32.xlu0 %v1168_v34 }
 0x2a3   :  { %v1172_v36 = vpop.xlane.xlu0 %1171 }
 0x2a4   :  { %v1173_v37 = vsub.f32 %v1168_v34, %v1172_v36 }
 0x2a6   :  { %v1174_v38 = vmul.f32 1.442695, %v1173_v37 }
 0x2a8   :  { %1572 = vpow2.f32 %v1174_v38 }
 0x2b2   :  { %v1573_v39 = vpop.eup %1572 }
 0x2b3   :  { %1176 = vadd.xlane.f32.xlu0 %v1573_v39 }
 0x340   :  { %v1177_v40 = vpop.xlane.xlu0 %1176 }
 0x341   :  { %1574 = vrcp.f32 %v1177_v40 }
 0x34b   :  { %v1575_v41 = vpop.eup %1574 }
 0x34c   :  { %v1179_v42 = vmul.f32 %v1575_v41, %v1573_v39 }
 0x34e   :  { %1180 = vst [vmem:[#allocation2] sm:$0xff] %v1179_v42 }
 0x34f   :  { %1587 = shalt.err (!%p1584_p4)
}
 0x350   :  { %s1588_s9 = scalar_lea.hbm %s1975_s5, 128 }
 0x351   :  { %p1589_p5 = scmp.ne.s32.totalorder %s1975_s5, %s1588_s9  ;;  %p1592_p6 = scmp.lt.u32.totalorder %s1588_s9, %s1975_s5 }
 0x353   :  { %p1594_p7 = pnand %p1592_p6, %p1589_p5 }
 0x355   :  { %1597 = shalt.err (!%p1594_p7)
}
 0x356   :  { %1190 = dma.vmem_to_hbm [thread:$0]  %s1188_s6, 128, %s1975_s5, [#allocation3]  }
 0x357   :  { %1598 = dma.done.wait [#allocation3], 128  }
 0x358   :  { %1599 = vsyncadd [#allocation3], 4294967168 }
 0x359   :  { %1194 = vsyncpa [#allocation3], 1 }

</bundles_post_ra>
